<compile_context>
chip_gen: v6e
topology: v6e:2x2x1
jax: 0.10.0
libtpu: 0.0.40
codegen_flags: <defaults>
</compile_context>

<pallas_src>
import jax
import jax.numpy as jnp
import numpy as np
from jax import lax
from jax.experimental import pallas as pl
from jax.experimental.pallas import tpu as pltpu

_LANES = 128  # 32 priors * 4 coords per 128-lane row


def _decode_center_size_kernel(loc_ref, anc_ref, var_ref, out_ref):
    """CENTER_SIZE decode on lane-interleaved coordinates.

    Lane layout inside each 128-lane row: [x0 y0 X0 Y0 x1 y1 X1 Y1 ...] (groups of 4).
      loc_ref : [1, tm, 128]  location predictions for one batch element
      anc_ref : [tm, 128]     prior boxes
      var_ref : [tm, 128]     prior variances
      out_ref : [1, tm, 128]  decoded bboxes
    """
    anc = anc_ref[...]
    var = var_ref[...]
    loc = loc_ref[0]

    # Value two lanes to the right == the matching "max" coordinate of the SAME
    # prior.  Rolled values are only consumed at lanes l % 4 in {0, 1}, so the
    # wrap-around at lanes 126/127 is never read.
    anc_hi = pltpu.roll(anc, _LANES - 2, 1)
    var_hi = pltpu.roll(var, _LANES - 2, 1)
    loc_hi = pltpu.roll(loc, _LANES - 2, 1)

    prior_wh = anc_hi - anc                  # valid at lanes l % 4 < 2
    prior_c = (anc_hi + anc) * 0.5           # valid at lanes l % 4 < 2

    center = loc * var * prior_wh + prior_c
    half = jnp.exp(var_hi * loc_hi) * prior_wh * 0.5

    lo = center - half                       # xmin / ymin, valid at l % 4 < 2
    hi = pltpu.roll(center + half, 2, 1)     # xmax / ymax, valid at l % 4 >= 2

    lane = lax.broadcasted_iota(jnp.int32, lo.shape, 1)
    out_ref[0] = jnp.where(lane % 4 < 2, lo, hi)


def _decode_corner_kernel(loc_ref, anc_ref, var_ref, out_ref):
    """CORNER decode: bboxes = anchors + variances * location (pure elementwise)."""
    out_ref[0] = anc_ref[...] + var_ref[...] * loc_ref[0]


def detection_output(box_logits, proposals, class_preds, *,
                     num_priors, num_classes, prior_size=4,
                     code_type_corner=False, variance_encoded_in_target=False,
                     row_tile=256):
    """Pallas implementation of DetectionOutput.forward (share_location=1).

    row_tile: prior-axis tile measured in 128-lane rows (32 priors / row).
      Default 256 rows == 8192 priors per grid step (~128 KiB f32 per streamed
      block) -- comfortably inside the default scoped-VMEM limit on v5e/v6e and
      well under v7x's 64 MiB physical VMEM even with double buffering.
    """
    if variance_encoded_in_target:
        # TODO(synk): variance_encoded_in_target=True decode branch not implemented.
        raise NotImplementedError("variance_encoded_in_target=True is not supported")
    assert row_tile % 8 == 0, "row_tile must be a multiple of 8 sublanes"

    B = box_logits.shape[0]
    N = num_priors
    C = num_classes

    rows = pl.cdiv(N * 4, _LANES)            # number of 128-lane coordinate rows
    tm = rows if rows <= row_tile else row_tile
    grid_rows = pl.cdiv(rows, tm)
    R = grid_rows * tm
    pad = R * _LANES - N * 4

    # ---- glue: flat, contiguous reshapes only (no transposes / extra HBM passes) ----
    loc_flat = box_logits.reshape(B, N * 4)
    prior = proposals.reshape(-1, N, prior_size)[..., -4:].reshape(-1, 2, N, 4)
    anc_flat = prior[0, 0].reshape(N * 4)
    var_flat = prior[0, 1].reshape(N * 4)

    if pad:  # zero padding is numerically safe: wh = 0, exp(0) = 1 -> padded boxes are 0
        loc_flat = jnp.pad(loc_flat, ((0, 0), (0, pad)))
        anc_flat = jnp.pad(anc_flat, (0, pad))
        var_flat = jnp.pad(var_flat, (0, pad))

    loc_t = loc_flat.reshape(B, R, _LANES).astype(jnp.float32)
    anc_t = anc_flat.reshape(R, _LANES).astype(jnp.float32)
    var_t = var_flat.reshape(R, _LANES).astype(jnp.float32)

    kernel = _decode_corner_kernel if code_type_corner else _decode_center_size_kernel

    bbox_t = pl.pallas_call(
        kernel,
        out_shape=jax.ShapeDtypeStruct((B, R, _LANES), jnp.float32),
        grid_spec=pltpu.PrefetchScalarGridSpec(
            num_scalar_prefetch=0,
            # Prior-tile axis outermost (many parallel steps for pipeline/megacore);
            # batch innermost so the anchor/variance block index does not change
            # between consecutive steps and is not re-fetched.
            grid=(grid_rows, B),
            in_specs=[
                pl.BlockSpec((1, tm, _LANES), lambda n, b: (b, n, 0)),   # location
                pl.BlockSpec((tm, _LANES), lambda n, b: (n, 0)),         # anchors
                pl.BlockSpec((tm, _LANES), lambda n, b: (n, 0)),         # variances
            ],
            out_specs=pl.BlockSpec((1, tm, _LANES), lambda n, b: (b, n, 0)),
        ),
        compiler_params=pltpu.CompilerParams(
            dimension_semantics=("parallel", "parallel")),
    )(loc_t, anc_t, var_t)

    bbox_flat = bbox_t.reshape(B, R * _LANES)
    if pad:
        bbox_flat = bbox_flat[:, :N * 4]
    bboxes = bbox_flat.reshape(B, N, 1, 4)

    # Scores: class 0 only (num_loc_classes == 1) and zero arithmetic -> a single
    # XLA strided slice; streaming it through the kernel would only add HBM traffic.
    scores = class_preds.reshape(B, N, C)[..., :1]
    return bboxes, scores


def detection_output_reference(box_logits, proposals, class_preds, *,
                               num_priors, num_classes, prior_size=4,
                               code_type_corner=False):
    """Pure-JAX replica of the PyTorch forward (for correctness check)."""
    B = box_logits.shape[0]
    N, C = num_priors, num_classes
    location = box_logits.reshape(B, N, 1, 4)
    scores = class_preds.reshape(B, N, C)[..., :1]
    prior = proposals.reshape(-1, N, prior_size)[..., -4:].reshape(-1, 2, N, 4)
    anchors = prior[:, 0].reshape(1, -1, 1, 4)
    variances = prior[:, 1].reshape(1, -1, 1, 4)
    if code_type_corner:
        bboxes = anchors + variances * location
    else:
        prior_wh = anchors[..., 2:] - anchors[..., :2]
        prior_center = (anchors[..., 2:] + anchors[..., :2]) * 0.5
        center = location[..., :2] * variances[..., :2] * prior_wh + prior_center
        size = jnp.exp(variances[..., 2:] * location[..., 2:]) * prior_wh
        bboxes = jnp.concatenate([center - size / 2, center + size / 2], -1)
    return bboxes, scores


if __name__ == "__main__":
    def make_inputs(key, B, N, C):
        k1, k2, k3, k4 = jax.random.split(key, 4)
        box_logits = jax.random.normal(k1, (B, N * 4), dtype=jnp.float32) * 0.1
        centers = jax.random.uniform(k2, (N, 2), dtype=jnp.float32, minval=0.1, maxval=0.9)
        halves = jax.random.uniform(k3, (N, 2), dtype=jnp.float32, minval=0.02, maxval=0.1)
        prior_boxes = jnp.concatenate([centers - halves, centers + halves], -1)   # [N, 4]
        prior_vars = jnp.broadcast_to(jnp.array([0.1, 0.1, 0.2, 0.2], jnp.float32), (N, 4))
        proposals = jnp.stack([prior_boxes.reshape(-1), prior_vars.reshape(-1)])[None]  # [1,2,N*4]
        class_preds = jax.random.uniform(k4, (B, N * C), dtype=jnp.float32)
        return box_logits, proposals, class_preds

    # (B, N, C, code_type_corner, row_tile)
    configs = [
        (2, 512, 4, False, 256),   # module config: CENTER_SIZE, single prior tile
        (3, 2000, 6, False, 16),   # multi-tile grid + lane padding (N % 32 != 0)
        (2, 512, 4, True, 256),    # CORNER code type
    ]

    key = jax.random.PRNGKey(0)
    for (B, N, C, corner, row_tile) in configs:
        key, sub = jax.random.split(key)
        box_logits, proposals, class_preds = make_inputs(sub, B, N, C)

        bboxes, scores = detection_output(
            box_logits, proposals, class_preds,
            num_priors=N, num_classes=C, prior_size=4,
            code_type_corner=corner, row_tile=row_tile)
        jax.block_until_ready((bboxes, scores))

        ref_bboxes, ref_scores = detection_output_reference(
            box_logits, proposals, class_preds,
            num_priors=N, num_classes=C, prior_size=4,
            code_type_corner=corner)

        np.testing.assert_allclose(np.asarray(bboxes), np.asarray(ref_bboxes),
                                   rtol=1e-5, atol=1e-6)
        np.testing.assert_allclose(np.asarray(scores), np.asarray(ref_scores),
                                   rtol=1e-5, atol=1e-6)
        assert bboxes.shape == (B, N, 1, 4) and scores.shape == (B, N, 1)

    print("KERNEL_OK")
</pallas_src>

<mosaic_0001>
module attributes {stable_mosaic.version = 11 : i64} {
  func.func @_decode_center_size_kernel(%arg0: i32, %arg1: i32, %arg2: memref<1x16x128xf32, #tpu.memory_space<vmem>>, %arg3: memref<16x128xf32, #tpu.memory_space<vmem>>, %arg4: memref<16x128xf32, #tpu.memory_space<vmem>>, %arg5: memref<1x16x128xf32, #tpu.memory_space<vmem>>) attributes {dimension_semantics = [#tpu.dimension_semantics<parallel>, #tpu.dimension_semantics<parallel>], iteration_bounds = array<i64: 1, 2>, scalar_prefetch = 0 : i64, scratch_operands = 0 : i64, tpu.core_type = #tpu.core_type<tc>, window_params = [{transform_indices = @transform_0, window_bounds = array<i64: 1, 16, 128>}, {transform_indices = @transform_1, window_bounds = array<i64: 16, 128>}, {transform_indices = @transform_2, window_bounds = array<i64: 16, 128>}, {transform_indices = @transform_3, window_bounds = array<i64: 1, 16, 128>}]} {
    %c0 = arith.constant 0 : index
    %c0_0 = arith.constant 0 : index
    %0 = vector.load %arg3[%c0, %c0_0] : memref<16x128xf32, #tpu.memory_space<vmem>>, vector<16x128xf32>
    %c0_1 = arith.constant 0 : index
    %c0_2 = arith.constant 0 : index
    %1 = vector.load %arg4[%c0_1, %c0_2] : memref<16x128xf32, #tpu.memory_space<vmem>>, vector<16x128xf32>
    %c0_3 = arith.constant 0 : index
    %c0_4 = arith.constant 0 : index
    %c0_5 = arith.constant 0 : index
    %2 = vector.load %arg2[%c0_3, %c0_4, %c0_5] : memref<1x16x128xf32, #tpu.memory_space<vmem>>, vector<1x16x128xf32>
    %3 = vector.shape_cast %2 : vector<1x16x128xf32> to vector<16x128xf32>
    %c126_i32 = arith.constant 126 : i32
    %4 = tpu.dynamic_rotate %0 by %c126_i32 dim 1 : vector<16x128xf32>, i32 -> vector<16x128xf32>
    %c126_i32_6 = arith.constant 126 : i32
    %5 = tpu.dynamic_rotate %1 by %c126_i32_6 dim 1 : vector<16x128xf32>, i32 -> vector<16x128xf32>
    %c126_i32_7 = arith.constant 126 : i32
    %6 = tpu.dynamic_rotate %3 by %c126_i32_7 dim 1 : vector<16x128xf32>, i32 -> vector<16x128xf32>
    %7 = arith.subf %4, %0 : vector<16x128xf32>
    %8 = arith.addf %4, %0 : vector<16x128xf32>
    %cst = arith.constant 5.000000e-01 : f32
    %9 = vector.broadcast %cst : f32 to vector<16x128xf32>
    %10 = arith.mulf %8, %9 : vector<16x128xf32>
    %11 = arith.mulf %3, %1 : vector<16x128xf32>
    %12 = arith.mulf %11, %7 : vector<16x128xf32>
    %13 = arith.addf %12, %10 : vector<16x128xf32>
    %14 = arith.mulf %5, %6 : vector<16x128xf32>
    %15 = math.exp %14 : vector<16x128xf32>
    %16 = arith.mulf %15, %7 : vector<16x128xf32>
    %cst_8 = arith.constant 5.000000e-01 : f32
    %17 = vector.broadcast %cst_8 : f32 to vector<16x128xf32>
    %18 = arith.mulf %16, %17 : vector<16x128xf32>
    %19 = arith.subf %13, %18 : vector<16x128xf32>
    %20 = arith.addf %13, %18 : vector<16x128xf32>
    %c2_i32 = arith.constant 2 : i32
    %21 = tpu.dynamic_rotate %20 by %c2_i32 dim 1 : vector<16x128xf32>, i32 -> vector<16x128xf32>
    %22 = tpu.iota {dimensions = array<i32: 1>} : vector<16x128xi32>
    %c4_i32 = arith.constant 4 : i32
    %c0_i32 = arith.constant 0 : i32
    %23 = arith.cmpi eq, %c4_i32, %c0_i32 : i32
    %c1_i32 = arith.constant 1 : i32
    %24 = arith.select %23, %c1_i32, %c4_i32 : i32
    %25 = vector.broadcast %24 : i32 to vector<16x128xi32>
    %26 = arith.remsi %22, %25 : vector<16x128xi32>
    %c0_i32_9 = arith.constant 0 : i32
    %27 = vector.broadcast %c0_i32_9 : i32 to vector<16x128xi32>
    %28 = arith.cmpi ne, %26, %27 : vector<16x128xi32>
    %c0_i32_10 = arith.constant 0 : i32
    %29 = vector.broadcast %c0_i32_10 : i32 to vector<16x128xi32>
    %30 = arith.cmpi slt, %26, %29 : vector<16x128xi32>
    %c0_i32_11 = arith.constant 0 : i32
    %31 = arith.cmpi slt, %24, %c0_i32_11 : i32
    %32 = vector.broadcast %31 : i1 to vector<16x128xi1>
    %33 = vector.broadcast %32 : vector<16x128xi1> to vector<16x128xi1>
    %34 = arith.xori %30, %33 : vector<16x128xi1>
    %35 = arith.andi %34, %28 : vector<16x128xi1>
    %36 = vector.broadcast %24 : i32 to vector<16x128xi32>
    %37 = arith.addi %26, %36 : vector<16x128xi32>
    %38 = arith.select %35, %37, %26 : vector<16x128xi1>, vector<16x128xi32>
    %c2_i32_12 = arith.constant 2 : i32
    %39 = vector.broadcast %c2_i32_12 : i32 to vector<16x128xi32>
    %40 = arith.cmpi slt, %38, %39 : vector<16x128xi32>
    %41 = arith.select %40, %19, %21 : vector<16x128xi1>, vector<16x128xf32>
    %c0_13 = arith.constant 0 : index
    %c0_14 = arith.constant 0 : index
    %c0_15 = arith.constant 0 : index
    %42 = vector.load %arg5[%c0_13, %c0_14, %c0_15] : memref<1x16x128xf32, #tpu.memory_space<vmem>>, vector<1x16x128xf32>
    %43 = vector.shape_cast %42 : vector<1x16x128xf32> to vector<16x128xf32>
    %44 = vector.shape_cast %41 : vector<16x128xf32> to vector<1x16x128xf32>
    tpu.vector_store %arg5[%c0_13, %c0_14, %c0_15], %44 {strides = array<i32>} : memref<1x16x128xf32, #tpu.memory_space<vmem>>, vector<1x16x128xf32>,
    return
  }
  func.func @transform_0(%arg0: i32, %arg1: i32) -> (i32, i32, i32) {
    %c0_i32 = arith.constant 0 : i32
    %c0_i32_0 = arith.constant 0 : i32
    return %arg1, %arg0, %c0_i32 : i32, i32, i32
  }
  func.func @transform_1(%arg0: i32, %arg1: i32) -> (i32, i32) {
    %c0_i32 = arith.constant 0 : i32
    %c0_i32_0 = arith.constant 0 : i32
    return %arg0, %c0_i32 : i32, i32
  }
  func.func @transform_2(%arg0: i32, %arg1: i32) -> (i32, i32) {
    %c0_i32 = arith.constant 0 : i32
    %c0_i32_0 = arith.constant 0 : i32
    return %arg0, %c0_i32 : i32, i32
  }
  func.func @transform_3(%arg0: i32, %arg1: i32) -> (i32, i32, i32) {
    %c0_i32 = arith.constant 0 : i32
    %c0_i32_0 = arith.constant 0 : i32
    return %arg1, %arg0, %c0_i32 : i32, i32, i32
  }
}

</mosaic_0001>

<bundles_post_ra>
// kernel: tpu_custom_call.1
= control target key start
LH: loop header
LB: loop body
LE: loop exit
PB: predicated region body
PF: predicated region fallthrough
CT: control target
= control target key end

     0   :  { %8 = vsyncpa [#allocation3], 0  ;;  %s960_s0 = inlined_call_operand.hbm [shape: f32[2,16,128], index: 0, kind: input, shape index: {}]   ;;  %s961_s1 = inlined_call_operand.hbm [shape: f32[16,128], index: 1, kind: input, shape index: {}]   ;;  %s962_s2 = inlined_call_operand.hbm [shape: f32[16,128], index: 2, kind: input, shape index: {}]   ;;  %s963_s3 = inlined_call_operand.hbm [shape: f32[2,16,128], index: 3, kind: output, shape index: {}]  }
   0x1   :  { %10 = vsyncpa [#allocation3 + $0x1], 0 }
   0x2   :  { %11 = vsyncpa [#allocation6], 0 }
   0x3   :  { %12 = vsyncpa [#allocation4], 0 }
   0x4   :  { %14 = vsyncpa [#allocation4 + $0x1], 0  ;;  %s759_s12 = smov 0   ;;  %s761_s13 = smov 0  }
   0x5   :  { %s763_s14 = smov 0   ;;  %s765_s15 = smov 0  }
   0x6   :  { %s767_s16 = smov 0   ;;  %s769_s17 = smov 0  }
   0x7 LB: > { %s449_s18 = sadd.s32 4294967295, %s727_s17   ;;  %s450_s19 = sadd.s32 4294967294, %s727_s17   ;;  %s727_s17 = sphi %s769_s17, %s20_s17   ;;  %s723_s16 = sphi %s767_s16, %s980_s16   ;;  %s719_s15 = sphi %s765_s15, %s979_s15   ;;  %s715_s14 = sphi %s763_s14, %s978_s14   ;;  %s711_s13 = sphi %s761_s13, %s977_s13   ;;  %s707_s12 = sphi %s759_s12, %s976_s12  }
   0x8   : > { %p54_p0 = scmp.ne.s32.totalorder %s711_s13, %s707_s12  ;;  %p793_p1 = scmp.eq.s32.totalorder %s449_s18, 0 }
   0x9   : > { %p797_p2 = scmp.eq.s32.totalorder %s449_s18, 1  ;;  %p138_p3 = scmp.eq.s32.totalorder %s450_s19, 1 }
   0xa   : > { %p803_p4 = por %p793_p1, %p54_p0  ;;  %p451_p5 = scmp.ge.s32.totalorder %s727_s17, 1 }
   0xb   : > { %p808_p6 = por %p138_p3, %p54_p0  ;;  %p145_p7 = scmp.lt.s32.totalorder %s727_s17, 3 }
   0xc   : > { %s729_s25 = smov [#allocation5]   ;;  %s730_s28 = smov [#allocation7]  }
   0xd   : > { %s968_s23 = scalar_select %p808_p6, 1, 0 }
   0xe   : > { %p813_p8 = pnand %p451_p5, %p145_p7  ;;  %s160_s26 = sshll.u32 %s729_s25, 4  ;;  %s161_s26 = int_to_ptr.vmem [resolvable:$true] %s160_s26 }
   0xf   : > { %s176_s29 = sshll.u32 %s730_s28, 4  ;;  %s574_s30 = scalar_lea.vmem %s161_s26, 256  ;;  %s177_s29 = int_to_ptr.vmem [resolvable:$true] %s176_s29 }
  0x10   : > { %p482_p9 = pneg %p813_p8  ;;  %p575_p13 = scmp.ne.s32.totalorder %s161_s26, %s574_s30 }
  0x11   : > { %p582_p5 = scmp.lt.s32.totalorder %s161_s26, %s161_s26  ;;  %p583_p7 = scmp.lt.s32.totalorder %s574_s30, %s574_s30 }
  0x12   : > { %p822_p11 = pnand %p482_p9, %p793_p1 }
  0x13   : > { %p584_p10 = por %p583_p7, %p582_p5 }
  0x14   : > { %p565_p12 = pneg %p822_p11 }
  0x16   : > { %p577_p0 = pnand %p575_p13, %p565_p12 }
  0x18   : > { %p578_p3 = pneg %p577_p0 }
  0x1a   : > { %p585_p9 = pnand %p584_p10, %p578_p3 }
  0x1c   : > { %588 = shalt.err (!%p585_p9)
}
  0x1d   : > { %s964_s4 = smov 128   ;;  %s732_s5 = smov 8  }
  0x1e   : > { %485 = dma.hbm_to_vmem [thread:$0]  (!%p822_p11), %s961_s1, 256, %s161_s26, [#allocation6], %s964_s4, %s964_s4, %s732_s5  }
  0x1f   : > { %s600_s8 = scalar_lea.vmem %s177_s29, 256  ;;  %p608_p10 = scmp.lt.s32.totalorder %s177_s29, %s177_s29 }
  0x20   : > { %p601_p13 = scmp.ne.s32.totalorder %s177_s29, %s600_s8  ;;  %p609_p3 = scmp.lt.s32.totalorder %s600_s8, %s600_s8 }
  0x22   : > { %p603_p0 = pnand %p601_p13, %p565_p12  ;;  %p610_p7 = por %p609_p3, %p608_p10 }
  0x24   : > { %p604_p5 = pneg %p603_p0 }
  0x26   : > { %p611_p9 = pnand %p610_p7, %p604_p5 }
  0x28   : > { %614 = shalt.err (!%p611_p9)
}
  0x29   : > { %488 = dma.hbm_to_vmem [thread:$0]  (!%p822_p11), %s962_s2, 256, %s177_s29, [#allocation6], %s964_s4, %s964_s4, %s732_s5  }
  0x2a   : > { %s29_s11 = sadd.s32 1, %s723_s16  ;;  %s41_s18 = sadd.s32 1, %s715_s14 }
  0x2b   : > { %p30_p12 = scmp.ge.s32.totalorder %s29_s11, 2  ;;  %p48_p13 = scmp.ne.s32.totalorder %s715_s14, %s711_s13 }
  0x2c   : > { %p49_p0 = scmp.eq.s32.totalorder %s727_s17, 0  ;;  %p499_p5 = scmp.lt.s32.totalorder %s727_s17, 2 }
  0x2d   : > { %s982_s11 = smov (%p30_p12, %s29_s11), 0  ;;  %p860_p3 = por %p797_p2, %p48_p13 }
  0x2e   : > { %p50_p10 = por %p49_p0, %p48_p13  ;;  %s36_s25 = ssub.s32 %s723_s16, %s982_s11 }
  0x2f   : > { %s190_s26 = sand.u32 1, %s715_s14   ;;  %p39_p7 = scmp.eq.s32.totalorder %s36_s25, 0 }
  0x30   : > { %s455_s27 = sshll.u32 %s190_s26, 4  ;;  %s468_s28 = sshll.u32 %s723_s16, 8 }
  0x31   : > { %s869_s29 = scalar_select %p39_p7, %s715_s14, %s41_s18  }
  0x32   : > { %s202_s7 = scalar_lea.hbm %s960_s0, %s468_s28  ;;  %s194_s8 = scalar_lea.vmem [#allocation2], %s455_s27 }
  0x33   : > { %s203_s9 = sshll.u32 %s194_s8, 4  ;;  %p876_p11 = pnand %p499_p5, %p50_p10  ;;  %s204_s9 = int_to_ptr.vmem [resolvable:$true] %s203_s9 }
  0x34   : > { %s191_s10 = scalar_lea.sflag [#allocation3], %s190_s26  ;;  %s628_s25 = scalar_lea.vmem %s204_s9, 256 }
  0x35   : > { %p617_p2 = pneg %p876_p11  ;;  %p629_p9 = scmp.ne.s32.totalorder %s204_s9, %s628_s25 }
  0x36   : > { %s733_s18 = smov [#allocation2]  }
  0x37   : > { %p631_p12 = pnand %p629_p9, %p617_p2  ;;  %s633_s4 = sshll.u32 %s733_s18, 4  ;;  %s634_s4 = int_to_ptr.vmem [resolvable:$false] %s633_s4 }
  0x38   : > { %s635_s28 = scalar_lea.vmem %s634_s4, 512  ;;  %p636_p0 = scmp.lt.s32.totalorder %s204_s9, %s634_s4 }
  0x39   : > { %p632_p13 = pneg %p631_p12  ;;  %p637_p7 = scmp.lt.s32.totalorder %s635_s28, %s628_s25 }
  0x3b   : > { %p638_p6 = por %p637_p7, %p636_p0 }
  0x3d   : > { %p639_p5 = pnand %p638_p6, %p632_p13 }
  0x3f   : > { %642 = shalt.err (!%p639_p5)
}
  0x40   : > { %s973_s27 = smov 128   ;;  %215 = sbr.rel (%p813_p8) target bundleno = 347 (0x15b), region = 32 }
  0x41   : > { %492 = dma.hbm_to_vmem [thread:$0]  (!%p876_p11), %s202_s7, 256, %s204_s9, %s191_s10, %s973_s27, %s973_s27, %s732_s5  }
  0x42   : > { %s890_s26 = sand.u32 (!%p813_p8), 1, %s711_s13  }
  0x43   : > { %s459_s4 = sshll.u32 (!%p813_p8), %s890_s26, 4  ;;  %s218_s30 = scalar_lea.sflag (!%p813_p8), [#allocation3], %s890_s26 }
  0x44   : > { %s221_s6 = scalar_lea.vmem (!%p813_p8), [#allocation2], %s459_s4 }
  0x45   : > { %694 = dma.done.wait (%p803_p4), %s218_s30, 256  }
  0x46   : > { %696 = vsyncadd (%p803_p4), %s218_s30, 4294967040 }
  0x47   : > { %698 = dma.done.wait (%p793_p1), [#allocation6], 512  }
  0x48   : > { %700 = vsyncadd (%p793_p1), [#allocation6], 4294966784  ;;  %v260_v0 = vld [vmem:[%s221_s6] sm:$0xff]  ;;  %s734_s24 = smov 126   ;;  %v261_v3 = vld [vmem:[%s221_s6 + $0x8] sm:$0xff]  ;;  %s735_s20 = smov 2   ;;  %v304_v38 = vlaneseq }
  0x49   : > { %v258_v1 = vld [vmem:[#allocation7] sm:$0xff]  ;;  %270 = vrot.lane.b32.xlu1 %v260_v0, %s734_s24  ;;  %v259_v4 = vld [vmem:[#allocation7 + $0x8] sm:$0xff]  ;;  %v256_v6 = vld [vmem:[#allocation5] sm:$0xff]  ;;  %s251_s22 = scalar_lea.vmem [#allocation8], %s459_s4  ;;  %s469_s7 = sshll.u32 %s719_s15, 8 }
  0x4a   : > { %266 = vrot.lane.b32.xlu0 %v258_v1, %s734_s24  ;;  %v280_v2 = vmul.f32 %v260_v0, %v258_v1  ;;  %v281_v5 = vmul.f32 %v261_v3, %v259_v4  ;;  %v257_v7 = vld [vmem:[#allocation5 + $0x8] sm:$0xff]  ;;  %v305_v39 = vand.u32 127, %v304_v38  ;;  %s339_s5 = sshll.u32 %s251_s22, 4  ;;  %s912_s21 = scalar_lea.hbm %s963_s3, %s469_s7  ;;  %s907_s5 = int_to_ptr.vmem [resolvable:$true] %s339_s5 }
  0x4b   : > { %s324_s10 = scalar_lea.sflag [#allocation4], %s890_s26  ;;  %s643_s25 = scalar_lea.vmem %s907_s5, 256 }
  0x4c   : > { %v310_v40 = vand.u32 3, %v305_v39  ;;  %p644_p1 = scmp.ne.s32.totalorder %s907_s5, %s643_s25  ;;  %s736_s15 = smov [#allocation8]  }
  0x4d   : > { %272 = vrot.lane.b32.xlu1 %v261_v3, %s734_s24  ;;  %s647_s18 = sshll.u32 %s736_s15, 4  ;;  %s648_s18 = int_to_ptr.vmem [resolvable:$false] %s647_s18 }
  0x4e   : > { %268 = vrot.lane.b32.xlu0 %v259_v4, %s734_s24  ;;  %vm318_vm0 = vcmp.lt.s32.totalorder %v310_v40, 2  ;;  %p645_p4 = pnand %p644_p1, %p860_p3  ;;  %s649_s28 = scalar_lea.vmem %s648_s18, 512 }
  0x4f   : > { %p650_p8 = scmp.lt.s32.totalorder %s907_s5, %s648_s18  ;;  %p651_p10 = scmp.lt.s32.totalorder %s649_s28, %s643_s25 }
  0x50   : > { %p646_p6 = pneg %p645_p4 }
  0x51   : > { %264 = vrot.lane.b32.xlu1 %v257_v7, %s734_s24  ;;  %p652_p11 = por %p651_p10, %p650_p8 }
  0x52   : > { %262 = vrot.lane.b32.xlu0 %v256_v6, %s734_s24 }
  0x53   : > { %p653_p2 = pnand %p652_p11, %p646_p6 }
  0xbb   : > { %v271_v8 = vpop.permute.xlu1 %270 }
  0xbc   : > { %v267_v9 = vpop.permute.xlu0 %266 }
  0xbd   : > { %v286_v10 = vmul.f32 %v271_v8, %v267_v9 }
  0xbf   : > { %v288_v11 = vmul.f32 1.442695, %v286_v10  ;;  %v273_v12 = vpop.permute.xlu1 %272 }
  0xc0   : > { %v269_v13 = vpop.permute.xlu0 %268 }
  0xc1   : > { %559 = vpow2.f32 %v288_v11  ;;  %v287_v14 = vmul.f32 %v273_v12, %v269_v13 }
  0xc3   : > { %v290_v15 = vmul.f32 1.442695, %v287_v14  ;;  %v265_v19 = vpop.permute.xlu1 %264 }
  0xc4   : > { %v263_v16 = vpop.permute.xlu0 %262  ;;  %v275_v22 = vsub.f32 %v265_v19, %v257_v7  ;;  %v277_v23 = vadd.f32 %v265_v19, %v257_v7 }
  0xc5   : > { %561 = vpow2.f32 %v290_v15  ;;  %v274_v17 = vsub.f32 %v263_v16, %v256_v6  ;;  %v276_v18 = vadd.f32 %v263_v16, %v256_v6 }
  0xc6   : > { %v279_v27 = vmul.f32 0.5, %v277_v23  ;;  %v283_v28 = vmul.f32 %v281_v5, %v275_v22 }
  0xc7   : > { %v278_v20 = vmul.f32 0.5, %v276_v18  ;;  %v282_v21 = vmul.f32 %v280_v2, %v274_v17 }
  0xc8   : > { %v285_v31 = vadd.f32 %v283_v28, %v279_v27 }
  0xc9   : > { %v284_v25 = vadd.f32 %v282_v21, %v278_v20 }
  0xce   : > { %v560_v24 = vpop.eup %559 }
  0xcf   : > { %v292_v26 = vmul.f32 %v560_v24, %v274_v17 }
  0xd1   : > { %v294_v29 = vmul.f32 0.5, %v292_v26 }
  0xd2   : > { %v562_v30 = vpop.eup %561 }
  0xd3   : > { %v293_v32 = vmul.f32 %v562_v30, %v275_v22  ;;  %v298_v33 = vadd.f32 %v294_v29, %v284_v25  ;;  %v296_v34 = vsub.f32 %v284_v25, %v294_v29 }
  0xd5   : > { %v295_v35 = vmul.f32 0.5, %v293_v32  ;;  %300 = vrot.lane.b32.xlu0 %v298_v33, %s735_s20 }
  0xd7   : > { %v299_v36 = vadd.f32 %v295_v35, %v285_v31  ;;  %v297_v37 = vsub.f32 %v285_v31, %v295_v35 }
  0xd9   : > { %302 = vrot.lane.b32.xlu1 %v299_v36, %s735_s20 }
 0x147   : > { %v301_v41 = vpop.permute.xlu0 %300 }
 0x148   : > { %v319_v42 = vsel %vm318_vm0, %v296_v34, %v301_v41 }
 0x149   : > { %321 = vst [vmem:[%s251_s22] sm:$0xff] %v319_v42 }
 0x14b   : > { %v303_v43 = vpop.permute.xlu1 %302 }
 0x14c   : > { %v320_v44 = vsel %vm318_vm0, %v297_v37, %v303_v43 }
 0x14d   : > { %322 = vst [vmem:[%s251_s22 + $0x8] sm:$0xff] %v320_v44 }
 0x14e   : > { %656 = shalt.err (!%p653_p2)
}
 0x14f   : > { %s657_s27 = scalar_lea.hbm %s912_s21, 256  ;;  %s661_s6 = scalar_lea.hbm %s963_s3, 512 }
 0x150   : > { %p658_p9 = scmp.ne.s32.totalorder %s912_s21, %s657_s27  ;;  %p662_p0 = scmp.lt.s32.totalorder %s912_s21, %s963_s3 }
 0x151   : > { %p663_p7 = scmp.lt.s32.totalorder %s661_s6, %s657_s27 }
 0x152   : > { %p659_p12 = pnand %p658_p9, %p860_p3 }
 0x153   : > { %p664_p5 = por %p663_p7, %p662_p0 }
 0x154   : > { %p660_p13 = pneg %p659_p12 }
 0x156   : > { %p665_p1 = pnand %p664_p5, %p660_p13 }
 0x158   : > { %668 = shalt.err (!%p665_p1)
}
 0x159   : > { %s737_s22 = smov 128   ;;  %s738_s7 = smov 8  }
 0x15a   : > { %480 = dma.vmem_to_hbm [thread:$0]  (%p860_p3), %s907_s5, 256, %s912_s21, %s324_s10, %s737_s22, %s737_s22, %s738_s7  }
 0x15b PF: > { %s354_s8 = sand.u32 1, %s707_s12   ;;  %p974_p4 = scmp.ne.s32.totalorder %s968_s23, 0 }
 0x15c   : > { %p975_p6 = scmp.ge.s32.totalorder %s727_s17, 2  ;;  %s355_s9 = scalar_lea.sflag [#allocation4], %s354_s8 }
 0x15e   : > { %p494_p8 = pnand %p975_p6, %p974_p4 }
 0x160   : > { %p495_p10 = pneg %p494_p8 }
 0x162   : > { %702 = dma.done.wait (%p495_p10), %s355_s9, 256  }
 0x163   : > { %704 = vsyncadd (%p495_p10), %s355_s9, 4294967040  ;;  %s20_s17 = sadd.s32 1, %s727_s17   ;;  %s976_s12 = smov %s711_s13 }
 0x164   : > { %p17_p11 = scmp.ge.s32.totalorder %s20_s17, 4   ;;  %s977_s13 = smov %s715_s14 }
 0x165   : > { %s978_s14 = smov %s869_s29  ;;  %s979_s15 = smov %s723_s16 }
 0x166   : > { %s980_s16 = smov %s982_s11  ;;  %19 = sbr.rel (!%p17_p11) target bundleno = 7 (0x7), region = 87 }
 0x16b   :  { %360 = vsyncpa [#allocation3], 1 }
 0x16c   :  { %362 = vsyncpa [#allocation3 + $0x1], 1 }
 0x16d   :  { %363 = vsyncpa [#allocation6], 1 }
 0x16e   :  { %364 = vsyncpa [#allocation4], 1 }
 0x16f   :  { %366 = vsyncpa [#allocation4 + $0x1], 1 }

</bundles_post_ra>
